<compile_context>
chip_gen: v5e
topology: v5e:2x2
jax: 0.10.0
libtpu: 0.0.40
codegen_flags: <defaults>
</compile_context>

<pallas_src>
import jax
import jax.numpy as jnp
from jax.experimental import pallas as pl
from jax.experimental.pallas import tpu as pltpu

# ---------------------------------------------------------------------------
# Module configuration (mirrors ConditionalDenseNN.__init__ arguments)
# ---------------------------------------------------------------------------
INPUT_DIM = 16
HIDDEN_DIMS = (32, 32)
OUTPUT_DIMS = (3, 5)          # n_output_layers = 2 -> forward returns a tuple
CONTEXT_DIM = 4
DEEP_CONTEXT_INJECTION = True
BATCH = 8
BN_EPS = 1e-5                 # torch.nn.BatchNorm1d default
LANE = 128                    # TPU lane width; all feature axes padded to this


# ---------------------------------------------------------------------------
# Static layer structure
# ---------------------------------------------------------------------------
def layer_structure():
    out_total = sum(OUTPUT_DIMS)
    deep_ctx = CONTEXT_DIM if DEEP_CONTEXT_INJECTION else 0
    dims = []
    if len(HIDDEN_DIMS):
        dims.append((INPUT_DIM + CONTEXT_DIM, HIDDEN_DIMS[0]))
        for i in range(1, len(HIDDEN_DIMS)):
            dims.append((HIDDEN_DIMS[i - 1] + deep_ctx, HIDDEN_DIMS[i]))
        dims.append((HIDDEN_DIMS[-1] + deep_ctx, out_total))
    else:
        dims.append((INPUT_DIM + CONTEXT_DIM, out_total))
    inject = [CONTEXT_DIM > 0 and (DEEP_CONTEXT_INJECTION or i == 0)
              for i in range(len(dims))]
    return dims, inject, out_total


# ---------------------------------------------------------------------------
# Pallas kernel (whole network in one invocation; everything fits in VMEM)
# ---------------------------------------------------------------------------
def make_kernel(n_layers, inject, has_ctx):
    def kernel(*refs):
        if has_ctx:
            x_ref, c_ref, wh_ref, wc_ref, vec_ref, out_ref = refs
        else:
            x_ref, wh_ref, vec_ref, out_ref = refs

        h = x_ref[...]            # (B, 128) f32, lanes >= INPUT_DIM are zero
        vecs = vec_ref[...]       # (8, 128): gamma_i/beta_i rows, last-used row = final bias

        if has_ctx:
            # One dot computes the context contribution of EVERY injected layer.
            ctx_all = jnp.dot(c_ref[...], wc_ref[...],
                              preferred_element_type=jnp.float32)  # (B, n_inject*128)

        j = 0
        for i in range(n_layers):
            # Tile-aligned static slice of the packed weight slab (128-row blocks).
            w_h = wh_ref[i * LANE:(i + 1) * LANE, :]
            z = jnp.dot(h, w_h, preferred_element_type=jnp.float32)
            if inject[i]:
                z = z + ctx_all[:, j * LANE:(j + 1) * LANE]   # lane-aligned slice
                j += 1

            if i < n_layers - 1:
                # BatchNorm1d, training-mode batch statistics (biased variance).
                # Hidden-layer Linear bias omitted: exactly cancelled by mean subtraction.
                mean = jnp.mean(z, axis=0, keepdims=True)
                var = jnp.mean(z * z, axis=0, keepdims=True) - mean * mean  # one-pass
                scale = vecs[2 * i:2 * i + 1, :] * jax.lax.rsqrt(var + BN_EPS)
                z = (z - mean) * scale + vecs[2 * i + 1:2 * i + 2, :]
                z = jnp.maximum(z, 0.0)                        # ReLU
            else:
                z = z + vecs[2 * i:2 * i + 1, :]               # final-layer bias
            h = z

        out_ref[...] = h.astype(out_ref.dtype)

    return kernel


# ---------------------------------------------------------------------------
# Parameter construction (torch.nn.Linear-style uniform init, weights stored
# as (in_features, out_features)), plus packing into the 3 VMEM slabs.
# ---------------------------------------------------------------------------
def init_raw_params(key):
    dims, inject, _ = layer_structure()
    raw = []
    for i, (fan_in, fan_out) in enumerate(dims):
        key, kw, kb, kg, ke = jax.random.split(key, 5)
        bound = float(fan_in) ** -0.5
        layer = {
            "w": jax.random.uniform(kw, (fan_in, fan_out), jnp.float32, -bound, bound),
            "b": jax.random.uniform(kb, (fan_out,), jnp.float32, -bound, bound),
        }
        if i < len(dims) - 1:
            # BatchNorm affine params (randomized to make the check non-trivial).
            layer["gamma"] = 1.0 + 0.1 * jax.random.normal(kg, (fan_out,), jnp.float32)
            layer["beta"] = 0.1 * jax.random.normal(ke, (fan_out,), jnp.float32)
        raw.append(layer)
    return raw


def pack_params(raw):
    dims, inject, _ = layer_structure()
    n_layers = len(dims)
    dc = CONTEXT_DIM
    n_inject = max(sum(inject), 1)

    wh = jnp.zeros((n_layers * LANE, LANE), jnp.float32)
    wc = jnp.zeros((LANE, n_inject * LANE), jnp.float32)
    vrows = max(8, -(-(2 * (n_layers - 1) + 1) // 8) * 8)
    vec = jnp.zeros((vrows, LANE), jnp.float32)

    j = 0
    for i, (fan_in, fan_out) in enumerate(dims):
        w = raw[i]["w"]
        if inject[i]:
            w_c, w_h = w[:dc], w[dc:]
            wc = wc.at[:dc, j * LANE:j * LANE + fan_out].set(w_c)
            j += 1
        else:
            w_h = w
        wh = wh.at[i * LANE:i * LANE + w_h.shape[0], :fan_out].set(w_h)

        if i < n_layers - 1:
            vec = vec.at[2 * i, :fan_out].set(raw[i]["gamma"])
            vec = vec.at[2 * i + 1, :fan_out].set(raw[i]["beta"])
        else:
            vec = vec.at[2 * i, :fan_out].set(raw[i]["b"])
    return wh, wc, vec


# ---------------------------------------------------------------------------
# Wrapper calling pallas_call
# ---------------------------------------------------------------------------
def conditional_dense_nn_forward(x, context, wh, wc, vec):
    dims, inject, out_total = layer_structure()
    n_layers = len(dims)
    has_ctx = CONTEXT_DIM > 0
    B = x.shape[0]

    x_pad = jnp.zeros((B, LANE), jnp.float32).at[:, :INPUT_DIM].set(x)
    inputs = [x_pad]
    if has_ctx:
        # torch: context = context.expand(x.size()[:-1] + (context.size(-1),))
        context = jnp.broadcast_to(context, x.shape[:-1] + (context.shape[-1],))
        c_pad = jnp.zeros((B, LANE), jnp.float32).at[:, :CONTEXT_DIM].set(context)
        inputs += [c_pad, wh, wc]
    else:
        inputs += [wh]
    inputs.append(vec)

    kernel = make_kernel(n_layers, inject, has_ctx)
    vmem = pltpu.MemorySpace.VMEM
    out = pl.pallas_call(
        kernel,
        out_shape=jax.ShapeDtypeStruct((B, LANE), jnp.float32),  # lane-dense padded output
        in_specs=[pl.BlockSpec(memory_space=vmem)] * len(inputs),
        out_specs=pl.BlockSpec(memory_space=vmem),
    )(*inputs)

    if len(OUTPUT_DIMS) == 1:
        return out[:, :out_total]
    starts = [0]
    for d in OUTPUT_DIMS:
        starts.append(starts[-1] + d)
    return tuple(out[:, s:e] for s, e in zip(starts[:-1], starts[1:]))


# ---------------------------------------------------------------------------
# Pure-JAX reference (mirrors the torch forward exactly: cat, Linear w/ bias,
# training-mode BatchNorm1d with two-pass biased variance, ReLU, output split)
# ---------------------------------------------------------------------------
def reference_forward(x, context, raw):
    dims, inject, out_total = layer_structure()
    context = jnp.broadcast_to(context, x.shape[:-1] + (context.shape[-1],))
    h = x
    for i in range(len(dims)):
        if inject[i]:
            h = jnp.concatenate([context, h], axis=-1)
        z = h @ raw[i]["w"] + raw[i]["b"]
        if i < len(dims) - 1:
            mean = jnp.mean(z, axis=0, keepdims=True)
            var = jnp.mean((z - mean) ** 2, axis=0, keepdims=True)
            z = (z - mean) * jax.lax.rsqrt(var + BN_EPS) * raw[i]["gamma"] + raw[i]["beta"]
            z = jnp.maximum(z, 0.0)
        h = z
    starts = [0]
    for d in OUTPUT_DIMS:
        starts.append(starts[-1] + d)
    return tuple(h[..., s:e] for s, e in zip(starts[:-1], starts[1:]))


if __name__ == "__main__":
    key = jax.random.PRNGKey(0)
    key, kx, kc, kp = jax.random.split(key, 4)
    x = jax.random.normal(kx, (BATCH, INPUT_DIM), jnp.float32)
    context = jax.random.normal(kc, (BATCH, CONTEXT_DIM), jnp.float32)

    raw = init_raw_params(kp)
    wh, wc, vec = pack_params(raw)

    outs = conditional_dense_nn_forward(x, context, wh, wc, vec)
    outs = jax.block_until_ready(outs)

    refs = reference_forward(x, context, raw)
    for o, r, d in zip(outs, refs, OUTPUT_DIMS):
        assert o.shape == (BATCH, d), (o.shape, d)
        assert jnp.allclose(o, r, atol=1e-4, rtol=1e-4), "mismatch vs reference"

    print("KERNEL_OK")
</pallas_src>

<mosaic_0001>
module attributes {stable_mosaic.version = 11 : i64} {
  func.func @kernel(%arg0: memref<8x128xf32, #tpu.memory_space<vmem>>, %arg1: memref<8x128xf32, #tpu.memory_space<vmem>>, %arg2: memref<384x128xf32, #tpu.memory_space<vmem>>, %arg3: memref<128x384xf32, #tpu.memory_space<vmem>>, %arg4: memref<8x128xf32, #tpu.memory_space<vmem>>, %arg5: memref<8x128xf32, #tpu.memory_space<vmem>>) attributes {dimension_semantics = [], scalar_prefetch = 0 : i64, scratch_operands = 0 : i64, tpu.core_type = #tpu.core_type<tc>} {
    %c0 = arith.constant 0 : index
    %c0_0 = arith.constant 0 : index
    %0 = vector.load %arg0[%c0, %c0_0] : memref<8x128xf32, #tpu.memory_space<vmem>>, vector<8x128xf32>
    %c0_1 = arith.constant 0 : index
    %c0_2 = arith.constant 0 : index
    %1 = vector.load %arg4[%c0_1, %c0_2] : memref<8x128xf32, #tpu.memory_space<vmem>>, vector<8x128xf32>
    %c0_3 = arith.constant 0 : index
    %c0_4 = arith.constant 0 : index
    %2 = vector.load %arg1[%c0_3, %c0_4] : memref<8x128xf32, #tpu.memory_space<vmem>>, vector<8x128xf32>
    %c0_5 = arith.constant 0 : index
    %c0_6 = arith.constant 0 : index
    %3 = vector.load %arg3[%c0_5, %c0_6] : memref<128x384xf32, #tpu.memory_space<vmem>>, vector<128x384xf32>
    %cst = arith.constant dense<0.000000e+00> : vector<8x384xf32>
    %4 = tpu.matmul %2, %3, %cst {dimension_numbers = #tpu.dot_dimension_numbers<[1], [0], [0], [1], [0, 0, 1, 1], [], []>} : vector<8x128xf32>, vector<128x384xf32>, vector<8x384xf32> -> vector<8x384xf32>
    %c0_7 = arith.constant 0 : index
    %c0_8 = arith.constant 0 : index
    %5 = vector.load %arg2[%c0_7, %c0_8] : memref<384x128xf32, #tpu.memory_space<vmem>>, vector<128x128xf32>
    %cst_9 = arith.constant dense<0.000000e+00> : vector<8x128xf32>
    %6 = tpu.matmul %0, %5, %cst_9 {dimension_numbers = #tpu.dot_dimension_numbers<[1], [0], [0], [1], [0, 0, 1, 1], [], []>} : vector<8x128xf32>, vector<128x128xf32>, vector<8x128xf32> -> vector<8x128xf32>
    %7 = vector.extract_strided_slice %4 {offsets = [0, 0], sizes = [8, 128], strides = [1, 1]} : vector<8x384xf32> to vector<8x128xf32>
    %8 = arith.addf %6, %7 : vector<8x128xf32>
    %cst_10 = arith.constant dense<0.000000e+00> : vector<128xf32>
    %9 = vector.multi_reduction <add>, %8, %cst_10 [0] : vector<8x128xf32> to vector<128xf32>
    %10 = vector.shape_cast %9 : vector<128xf32> to vector<1x128xf32>
    %cst_11 = arith.constant 8.000000e+00 : f32
    %11 = vector.broadcast %cst_11 : f32 to vector<1x128xf32>
    %12 = arith.divf %10, %11 : vector<1x128xf32>
    %13 = arith.mulf %8, %8 : vector<8x128xf32>
    %cst_12 = arith.constant dense<0.000000e+00> : vector<128xf32>
    %14 = vector.multi_reduction <add>, %13, %cst_12 [0] : vector<8x128xf32> to vector<128xf32>
    %15 = vector.shape_cast %14 : vector<128xf32> to vector<1x128xf32>
    %cst_13 = arith.constant 8.000000e+00 : f32
    %16 = vector.broadcast %cst_13 : f32 to vector<1x128xf32>
    %17 = arith.divf %15, %16 : vector<1x128xf32>
    %18 = arith.mulf %12, %12 : vector<1x128xf32>
    %19 = arith.subf %17, %18 : vector<1x128xf32>
    %20 = vector.extract_strided_slice %1 {offsets = [0, 0], sizes = [1, 128], strides = [1, 1]} : vector<8x128xf32> to vector<1x128xf32>
    %cst_14 = arith.constant 9.99999974E-6 : f32
    %21 = vector.broadcast %cst_14 : f32 to vector<1x128xf32>
    %22 = arith.addf %19, %21 : vector<1x128xf32>
    %23 = math.rsqrt %22 : vector<1x128xf32>
    %24 = arith.mulf %20, %23 : vector<1x128xf32>
    %25 = vector.broadcast %12 : vector<1x128xf32> to vector<8x128xf32>
    %26 = arith.subf %8, %25 : vector<8x128xf32>
    %27 = vector.broadcast %24 : vector<1x128xf32> to vector<8x128xf32>
    %28 = arith.mulf %26, %27 : vector<8x128xf32>
    %29 = vector.extract_strided_slice %1 {offsets = [1, 0], sizes = [1, 128], strides = [1, 1]} : vector<8x128xf32> to vector<1x128xf32>
    %30 = vector.broadcast %29 : vector<1x128xf32> to vector<8x128xf32>
    %31 = arith.addf %28, %30 : vector<8x128xf32>
    %cst_15 = arith.constant 0.000000e+00 : f32
    %32 = vector.broadcast %cst_15 : f32 to vector<8x128xf32>
    %33 = arith.maximumf %31, %32 : vector<8x128xf32>
    %c128 = arith.constant 128 : index
    %c0_16 = arith.constant 0 : index
    %34 = vector.load %arg2[%c128, %c0_16] : memref<384x128xf32, #tpu.memory_space<vmem>>, vector<128x128xf32>
    %cst_17 = arith.constant dense<0.000000e+00> : vector<8x128xf32>
    %35 = tpu.matmul %33, %34, %cst_17 {dimension_numbers = #tpu.dot_dimension_numbers<[1], [0], [0], [1], [0, 0, 1, 1], [], []>} : vector<8x128xf32>, vector<128x128xf32>, vector<8x128xf32> -> vector<8x128xf32>
    %36 = vector.extract_strided_slice %4 {offsets = [0, 128], sizes = [8, 128], strides = [1, 1]} : vector<8x384xf32> to vector<8x128xf32>
    %37 = arith.addf %35, %36 : vector<8x128xf32>
    %cst_18 = arith.constant dense<0.000000e+00> : vector<128xf32>
    %38 = vector.multi_reduction <add>, %37, %cst_18 [0] : vector<8x128xf32> to vector<128xf32>
    %39 = vector.shape_cast %38 : vector<128xf32> to vector<1x128xf32>
    %cst_19 = arith.constant 8.000000e+00 : f32
    %40 = vector.broadcast %cst_19 : f32 to vector<1x128xf32>
    %41 = arith.divf %39, %40 : vector<1x128xf32>
    %42 = arith.mulf %37, %37 : vector<8x128xf32>
    %cst_20 = arith.constant dense<0.000000e+00> : vector<128xf32>
    %43 = vector.multi_reduction <add>, %42, %cst_20 [0] : vector<8x128xf32> to vector<128xf32>
    %44 = vector.shape_cast %43 : vector<128xf32> to vector<1x128xf32>
    %cst_21 = arith.constant 8.000000e+00 : f32
    %45 = vector.broadcast %cst_21 : f32 to vector<1x128xf32>
    %46 = arith.divf %44, %45 : vector<1x128xf32>
    %47 = arith.mulf %41, %41 : vector<1x128xf32>
    %48 = arith.subf %46, %47 : vector<1x128xf32>
    %49 = vector.extract_strided_slice %1 {offsets = [2, 0], sizes = [1, 128], strides = [1, 1]} : vector<8x128xf32> to vector<1x128xf32>
    %cst_22 = arith.constant 9.99999974E-6 : f32
    %50 = vector.broadcast %cst_22 : f32 to vector<1x128xf32>
    %51 = arith.addf %48, %50 : vector<1x128xf32>
    %52 = math.rsqrt %51 : vector<1x128xf32>
    %53 = arith.mulf %49, %52 : vector<1x128xf32>
    %54 = vector.broadcast %41 : vector<1x128xf32> to vector<8x128xf32>
    %55 = arith.subf %37, %54 : vector<8x128xf32>
    %56 = vector.broadcast %53 : vector<1x128xf32> to vector<8x128xf32>
    %57 = arith.mulf %55, %56 : vector<8x128xf32>
    %58 = vector.extract_strided_slice %1 {offsets = [3, 0], sizes = [1, 128], strides = [1, 1]} : vector<8x128xf32> to vector<1x128xf32>
    %59 = vector.broadcast %58 : vector<1x128xf32> to vector<8x128xf32>
    %60 = arith.addf %57, %59 : vector<8x128xf32>
    %cst_23 = arith.constant 0.000000e+00 : f32
    %61 = vector.broadcast %cst_23 : f32 to vector<8x128xf32>
    %62 = arith.maximumf %60, %61 : vector<8x128xf32>
    %c256 = arith.constant 256 : index
    %c0_24 = arith.constant 0 : index
    %63 = vector.load %arg2[%c256, %c0_24] : memref<384x128xf32, #tpu.memory_space<vmem>>, vector<128x128xf32>
    %cst_25 = arith.constant dense<0.000000e+00> : vector<8x128xf32>
    %64 = tpu.matmul %62, %63, %cst_25 {dimension_numbers = #tpu.dot_dimension_numbers<[1], [0], [0], [1], [0, 0, 1, 1], [], []>} : vector<8x128xf32>, vector<128x128xf32>, vector<8x128xf32> -> vector<8x128xf32>
    %65 = vector.extract_strided_slice %4 {offsets = [0, 256], sizes = [8, 128], strides = [1, 1]} : vector<8x384xf32> to vector<8x128xf32>
    %66 = arith.addf %64, %65 : vector<8x128xf32>
    %67 = vector.extract_strided_slice %1 {offsets = [4, 0], sizes = [1, 128], strides = [1, 1]} : vector<8x128xf32> to vector<1x128xf32>
    %68 = vector.broadcast %67 : vector<1x128xf32> to vector<8x128xf32>
    %69 = arith.addf %66, %68 : vector<8x128xf32>
    %c0_26 = arith.constant 0 : index
    %c0_27 = arith.constant 0 : index
    %70 = vector.load %arg5[%c0_26, %c0_27] : memref<8x128xf32, #tpu.memory_space<vmem>>, vector<8x128xf32>
    tpu.vector_store %arg5[%c0_26, %c0_27], %69 {strides = array<i32>} : memref<8x128xf32, #tpu.memory_space<vmem>>, vector<8x128xf32>,
    return
  }
}

</mosaic_0001>

<bundles_post_ra>
// kernel: tpu_custom_call.1
= control target key start
LH: loop header
LB: loop body
LE: loop exit
PB: predicated region body
PF: predicated region fallthrough
CT: control target
= control target key end

     0   :  { %10 = vsyncpa [#allocation3], 0  ;;  %s664_s0 = inlined_call_operand.hbm [shape: f32[8,128], index: 0, kind: input, shape index: {}]   ;;  %s665_s1 = inlined_call_operand.hbm [shape: f32[8,128], index: 1, kind: input, shape index: {}]   ;;  %s666_s2 = inlined_call_operand.hbm [shape: f32[384,128], index: 2, kind: input, shape index: {}]   ;;  %s667_s3 = inlined_call_operand.hbm [shape: f32[128,384], index: 3, kind: input, shape index: {}]   ;;  %s668_s4 = inlined_call_operand.hbm [shape: f32[8,128], index: 4, kind: input, shape index: {}]   ;;  %s669_s5 = inlined_call_operand.hbm [shape: f32[8,128], index: 5, kind: output, shape index: {}]  }
   0x1   :  { %11 = vsyncpa [#allocation6], 0 }
   0x2   :  { %12 = vsyncpa [#allocation9], 0  ;;  %s30_s20 = sshll.u32 %s665_s1, 4  ;;  %s31_s20 = int_to_ptr.hbm [resolvable:$true] %s30_s20 }
   0x3   :  { %13 = vsyncpa [#allocation4], 0  ;;  %s580_s21 = smov [#allocation5]   ;;  %s53_s25 = sshll.u32 %s667_s3, 4  ;;  %s54_s25 = int_to_ptr.hbm [resolvable:$true] %s53_s25 }
   0x4   :  { %s32_s22 = sshll.u32 %s580_s21, 4  ;;  %s581_s26 = smov [#allocation8]   ;;  %s33_s22 = int_to_ptr.vmem [resolvable:$true] %s32_s22 }
   0x5   :  { %35 = dma.hbm_to_vmem [thread:$0]  %s31_s20, 128, %s33_s22, [#allocation6]  }
   0x6   :  { %s55_s27 = sshll.u32 %s581_s26, 4  ;;  %s582_s28 = smov 384   ;;  %s56_s27 = int_to_ptr.vmem [resolvable:$true] %s55_s27 }
   0x7   :  { %s583_s29 = smov 24   ;;  %s19_s1 = sshll.u32 %s664_s0, 4  ;;  %s20_s1 = int_to_ptr.hbm [resolvable:$true] %s19_s1 }
   0x8   :  { %61 = dma.hbm_to_vmem [thread:$0]  %s54_s25, 6144, %s56_s27, [#allocation9], %s582_s28, %s582_s28, %s583_s29  }
   0x9   :  { %s584_s7 = smov [#allocation2]   ;;  %s40_s3 = sshll.u32 %s666_s2, 4  ;;  %s41_s3 = int_to_ptr.hbm [resolvable:$true] %s40_s3 }
   0xa   :  { %s21_s8 = sshll.u32 %s584_s7, 4  ;;  %s585_s11 = smov [#allocation7]   ;;  %s22_s8 = int_to_ptr.vmem [resolvable:$true] %s21_s8 }
   0xb   :  { %24 = dma.hbm_to_vmem [thread:$0]  %s20_s1, 128, %s22_s8, [#allocation3]  }
   0xc   :  { %s42_s12 = sshll.u32 %s585_s11, 4  ;;  %s586_s13 = smov 128   ;;  %s43_s12 = int_to_ptr.vmem [resolvable:$true] %s42_s12 }
   0xd   :  { %s587_s14 = smov 8   ;;  %s67_s0 = sshll.u32 %s668_s4, 4  ;;  %s68_s0 = int_to_ptr.hbm [resolvable:$true] %s67_s0 }
   0xe   :  { %48 = dma.hbm_to_vmem [thread:$0]  %s41_s3, 6144, %s43_s12, [#allocation6], %s586_s13, %s586_s13, %s587_s14  }
   0xf   :  { %s588_s17 = smov [#allocation10]  }
  0x10   :  { %s69_s18 = sshll.u32 %s588_s17, 4  ;;  %s70_s18 = int_to_ptr.vmem [resolvable:$true] %s69_s18 }
  0x11   :  { %72 = dma.hbm_to_vmem [thread:$0]  %s68_s0, 128, %s70_s18, [#allocation9]  }
  0x12   :  { %572 = dma.done.wait [#allocation3], 128  }
  0x13   :  { %573 = vsyncadd [#allocation3], 4294967168 }
  0x14   :  { %574 = dma.done.wait [#allocation6], 6272  }
  0x15   :  { %575 = vsyncadd [#allocation6], 4294961024 }
  0x16   :  { %576 = dma.done.wait [#allocation9], 6272  }
  0x17   :  { %577 = vsyncadd [#allocation9], 4294961024  ;;  %v219_v0 = vld [vmem:[#allocation7 + $0x78] sm:$0xff]  ;;  %v218_v1 = vld [vmem:[#allocation7 + $0x70] sm:$0xff]  ;;  %v589_v42 = vmov 8.0   ;;  %s590_s2 = smov [#allocation11]  }
  0x18   :  { %220 = vmatpush.msra.mxu3 %v219_v0  ;;  %v141_v2 = vld [vmem:[#allocation8 + $0x168] sm:$0xff]  ;;  %v138_v3 = vld [vmem:[#allocation8 + $0x150] sm:$0xff]  ;;  %v135_v5 = vld [vmem:[#allocation8 + $0x138] sm:$0xff]  ;;  %422 = vrcp.f32 %v589_v42  ;;  %s397_s4 = sshll.u32 %s590_s2, 4  ;;  %s399_s21 = sshll.u32 %s669_s5, 4  ;;  %s398_s4 = int_to_ptr.vmem [resolvable:$true] %s397_s4  ;;  %s400_s21 = int_to_ptr.hbm [resolvable:$true] %s399_s21 }
  0x19   :  { %v217_v4 = vld [vmem:[#allocation7 + $0x68] sm:$0xff]  ;;  %144 = vmatpush.msra.mxu0 %v141_v2  ;;  %v216_v6 = vld [vmem:[#allocation7 + $0x60] sm:$0xff]  ;;  %v215_v8 = vld [vmem:[#allocation7 + $0x58] sm:$0xff] }
  0x1a   :  { %221 = vmatpush.msra.mxu3 %v218_v1  ;;  %v132_v7 = vld [vmem:[#allocation8 + $0x120] sm:$0xff]  ;;  %v129_v9 = vld [vmem:[#allocation8 + $0x108] sm:$0xff]  ;;  %v214_v10 = vld [vmem:[#allocation7 + $0x50] sm:$0xff] }
  0x1b   :  { %145 = vmatpush.msra.mxu0 %v138_v3  ;;  %v126_v11 = vld [vmem:[#allocation8 + $0xf0] sm:$0xff]  ;;  %v213_v12 = vld [vmem:[#allocation7 + $0x48] sm:$0xff]  ;;  %v123_v13 = vld [vmem:[#allocation8 + $0xd8] sm:$0xff] }
  0x1c   :  { %222 = vmatpush.msra.mxu3 %v217_v4  ;;  %v212_v14 = vld [vmem:[#allocation7 + $0x40] sm:$0xff]  ;;  %v211_v16 = vld [vmem:[#allocation7 + $0x38] sm:$0xff]  ;;  %v117_v17 = vld [vmem:[#allocation8 + $0xa8] sm:$0xff] }
  0x1d   :  { %146 = vmatpush.msra.mxu0 %v135_v5  ;;  %v120_v15 = vld [vmem:[#allocation8 + $0xc0] sm:$0xff]  ;;  %v210_v18 = vld [vmem:[#allocation7 + $0x30] sm:$0xff]  ;;  %v209_v20 = vld [vmem:[#allocation7 + $0x28] sm:$0xff] }
  0x1e   :  { %223 = vmatpush.msra.mxu3 %v216_v6  ;;  %v114_v19 = vld [vmem:[#allocation8 + $0x90] sm:$0xff]  ;;  %v111_v21 = vld [vmem:[#allocation8 + $0x78] sm:$0xff]  ;;  %v208_v22 = vld [vmem:[#allocation7 + $0x20] sm:$0xff]  ;;  %v423_v47 = vpop.eup %422 }
  0x1f   :  { %147 = vmatpush.msra.mxu0 %v132_v7  ;;  %v108_v23 = vld [vmem:[#allocation8 + $0x60] sm:$0xff]  ;;  %v207_v24 = vld [vmem:[#allocation7 + $0x18] sm:$0xff]  ;;  %v105_v25 = vld [vmem:[#allocation8 + $0x48] sm:$0xff]  ;;  %v247_v52 = vmul.f32 8.0, %v423_v47  ;;  %vm251_vm0 = vweird.f32 %v423_v47 }
  0x20   :  { %224 = vmatpush.msra.mxu3 %v215_v8  ;;  %v206_v26 = vld [vmem:[#allocation7 + $0x10] sm:$0xff]  ;;  %v205_v28 = vld [vmem:[#allocation7 + $0x8] sm:$0xff]  ;;  %v99_v29 = vld [vmem:[#allocation8 + $0x18] sm:$0xff] }
  0x21   :  { %148 = vmatpush.msra.mxu0 %v129_v9  ;;  %v102_v27 = vld [vmem:[#allocation8 + $0x30] sm:$0xff]  ;;  %v204_v30 = vld [vmem:[#allocation7] sm:$0xff]  ;;  %v636_v33 = vld [vmem:[#allocation5] sm:$0xff]  ;;  %v248_v59 = vsub.f32 1.0, %v247_v52 }
  0x22   :  { %225 = vmatpush.msra.mxu3 %v214_v10  ;;  %v93_v31 = vld [vmem:[#allocation2] sm:$0xff]  ;;  %v96_v32 = vld [vmem:[#allocation8] sm:$0xff]  ;;  %v297_v35 = vld [vmem:[#allocation7 + $0xf8] sm:$0xff] }
  0x23   :  { %149 = vmatpush.msra.mxu0 %v126_v11  ;;  %v142_v34 = vld [vmem:[#allocation8 + $0x170] sm:$0xff]  ;;  %v139_v36 = vld [vmem:[#allocation8 + $0x158] sm:$0xff]  ;;  %v136_v38 = vld [vmem:[#allocation8 + $0x140] sm:$0xff]  ;;  %v249_v3 = vmul.f32 %v423_v47, %v248_v59 }
  0x24   :  { %226 = vmatpush.msra.mxu3 %v213_v12  ;;  %164 = vmatpush.msra.mxu1 %v142_v34  ;;  %v296_v37 = vld [vmem:[#allocation7 + $0xf0] sm:$0xff]  ;;  %v295_v39 = vld [vmem:[#allocation7 + $0xe8] sm:$0xff]  ;;  %v294_v41 = vld [vmem:[#allocation7 + $0xe0] sm:$0xff] }
  0x25   :  { %150 = vmatpush.msra.mxu0 %v123_v13  ;;  %v133_v40 = vld [vmem:[#allocation8 + $0x128] sm:$0xff]  ;;  %v130_v43 = vld [vmem:[#allocation8 + $0x110] sm:$0xff]  ;;  %v293_v44 = vld [vmem:[#allocation7 + $0xd8] sm:$0xff]  ;;  %v250_v12 = vadd.f32 %v423_v47, %v249_v3 }
  0x26   :  { %227 = vmatpush.msra.mxu3 %v212_v14  ;;  %165 = vmatpush.msra.mxu1 %v139_v36  ;;  %v127_v45 = vld [vmem:[#allocation8 + $0xf8] sm:$0xff]  ;;  %v292_v46 = vld [vmem:[#allocation7 + $0xd0] sm:$0xff]  ;;  %v124_v48 = vld [vmem:[#allocation8 + $0xe0] sm:$0xff] }
  0x27   :  { %151 = vmatpush.msra.mxu0 %v120_v15  ;;  %v291_v49 = vld [vmem:[#allocation7 + $0xc8] sm:$0xff]  ;;  %v290_v51 = vld [vmem:[#allocation7 + $0xc0] sm:$0xff]  ;;  %v118_v53 = vld [vmem:[#allocation8 + $0xb0] sm:$0xff] }
  0x28   :  { %228 = vmatpush.msra.mxu3 %v211_v16  ;;  %166 = vmatpush.msra.mxu1 %v136_v38  ;;  %v121_v50 = vld [vmem:[#allocation8 + $0xc8] sm:$0xff]  ;;  %v289_v54 = vld [vmem:[#allocation7 + $0xb8] sm:$0xff]  ;;  %v288_v57 = vld [vmem:[#allocation7 + $0xb0] sm:$0xff] }
  0x29   :  { %152 = vmatpush.msra.mxu0 %v117_v17  ;;  %v115_v56 = vld [vmem:[#allocation8 + $0x98] sm:$0xff]  ;;  %v112_v61 = vld [vmem:[#allocation8 + $0x80] sm:$0xff]  ;;  %v287_v62 = vld [vmem:[#allocation7 + $0xa8] sm:$0xff] }
  0x2a   :  { %229 = vmatpush.msra.mxu3 %v210_v18  ;;  %167 = vmatpush.msra.mxu1 %v133_v40  ;;  %v109_v1 = vld [vmem:[#allocation8 + $0x68] sm:$0xff]  ;;  %v286_v2 = vld [vmem:[#allocation7 + $0xa0] sm:$0xff]  ;;  %v106_v6 = vld [vmem:[#allocation8 + $0x50] sm:$0xff] }
  0x2b   :  { %153 = vmatpush.msra.mxu0 %v114_v19  ;;  %v285_v7 = vld [vmem:[#allocation7 + $0x98] sm:$0xff]  ;;  %v284_v11 = vld [vmem:[#allocation7 + $0x90] sm:$0xff]  ;;  %v100_v15 = vld [vmem:[#allocation8 + $0x20] sm:$0xff] }
  0x2c   :  { %230 = vmatpush.msra.mxu3 %v209_v20  ;;  %168 = vmatpush.msra.mxu1 %v130_v43  ;;  %v103_v10 = vld [vmem:[#allocation8 + $0x38] sm:$0xff]  ;;  %v283_v16 = vld [vmem:[#allocation7 + $0x88] sm:$0xff]  ;;  %v282_v20 = vld [vmem:[#allocation7 + $0x80] sm:$0xff] }
  0x2d   :  { %154 = vmatpush.msra.mxu0 %v111_v21  ;;  %v97_v19 = vld [vmem:[#allocation8 + $0x8] sm:$0xff]  ;;  %v645_v21 = vsel %vm251_vm0, %v423_v47, %v250_v12  ;;  %v650_v36 = vld [vmem:[#allocation10] sm:$0xff]  ;;  %v122_v59 = vld [vmem:[#allocation8 + $0xd0] sm:$0xff] }
  0x2e   :  { %231 = vmatpush.msra.mxu3 %v208_v22  ;;  %169 = vmatpush.msra.mxu1 %v127_v45  ;;  %v279_v42 = vperm.slane %v650_v36, 1  ;;  %v140_v47 = vld [vmem:[#allocation8 + $0x160] sm:$0xff]  ;;  %v366_v52 = vld [vmem:[#allocation7 + $0x168] sm:$0xff] }
  0x2f   :  { %155 = vmatpush.msra.mxu0 %v108_v23 }
  0x30   :  { %232 = vmatpush.msra.mxu3 %v207_v24  ;;  %170 = vmatpush.msra.mxu1 %v124_v48  ;;  %v137_v48 = vld [vmem:[#allocation8 + $0x148] sm:$0xff] }
  0x31   :  { %156 = vmatpush.msra.mxu0 %v105_v25 }
  0x32   :  { %233 = vmatpush.msra.mxu3 %v206_v26  ;;  %171 = vmatpush.msra.mxu1 %v121_v50  ;;  %v367_v50 = vld [vmem:[#allocation7 + $0x170] sm:$0xff] }
  0x33   :  { %157 = vmatpush.msra.mxu0 %v102_v27 }
  0x34   :  { %234 = vmatpush.msra.mxu3 %v205_v28  ;;  %172 = vmatpush.msra.mxu1 %v118_v53  ;;  %v131_v53 = vld [vmem:[#allocation8 + $0x118] sm:$0xff] }
  0x35   :  { %158 = vmatpush.msra.mxu0 %v99_v29 }
  0x36   :  { %235 = vmatpush.msra.mxu3 %v204_v30  ;;  %173 = vmatpush.msra.mxu1 %v115_v56  ;;  %v364_v56 = vld [vmem:[#allocation7 + $0x158] sm:$0xff] }
  0x37   :  { %236 = vmatmul.f32.vlgmr.msra.gmra.mxu3 %v93_v31  ;;  %159 = vmatpush.msra.mxu0 %v96_v32 }
  0x38   :  { %160 = vmatmul.f32.vlgmr.msra.gmra.mxu0 %v636_v33  ;;  %174 = vmatpush.msra.mxu1 %v112_v61  ;;  %v119_v61 = vld [vmem:[#allocation8 + $0xb8] sm:$0xff] }
  0x39   :  { %298 = vmatpush.msrb.mxu0 %v297_v35 }
  0x3a   :  { %175 = vmatpush.msra.mxu1 %v109_v1  ;;  %v360_v1 = vld [vmem:[#allocation7 + $0x138] sm:$0xff] }
  0x3b   :  { %299 = vmatpush.msrb.mxu0 %v296_v37 }
  0x3c   :  { %176 = vmatpush.msra.mxu1 %v106_v6  ;;  %v110_v6 = vld [vmem:[#allocation8 + $0x70] sm:$0xff] }
  0x3d   :  { %300 = vmatpush.msrb.mxu0 %v295_v39 }
  0x3e   :  { %177 = vmatpush.msra.mxu1 %v103_v10  ;;  %v107_v10 = vld [vmem:[#allocation8 + $0x58] sm:$0xff] }
  0x3f   :  { %301 = vmatpush.msrb.mxu0 %v294_v41 }
  0x40   :  { %178 = vmatpush.msra.mxu1 %v100_v15  ;;  %v356_v15 = vld [vmem:[#allocation7 + $0x118] sm:$0xff] }
  0x41   :  { %302 = vmatpush.msrb.mxu0 %v293_v44 }
  0x42   :  { %179 = vmatpush.msra.mxu1 %v97_v19  ;;  %v355_v19 = vld [vmem:[#allocation7 + $0x110] sm:$0xff] }
  0x43   :  { %303 = vmatpush.msrb.mxu0 %v292_v46  ;;  %180 = vmatmul.f32.vlgmr.msra.gmra.mxu1 %v636_v33  ;;  %v143_v46 = vld [vmem:[#allocation8 + $0x178] sm:$0xff] }
  0x44   :  { %184 = vmatpush.msra.mxu2 %v143_v46 }
  0x45   :  { %304 = vmatpush.msrb.mxu0 %v291_v49  ;;  %v368_v49 = vld [vmem:[#allocation7 + $0x178] sm:$0xff] }
  0x46   :  { %185 = vmatpush.msra.mxu2 %v140_v47  ;;  %369 = vmatpush.msrb.mxu1 %v368_v49 }
  0x47   :  { %305 = vmatpush.msrb.mxu0 %v290_v51  ;;  %v134_v51 = vld [vmem:[#allocation8 + $0x130] sm:$0xff] }
  0x48   :  { %186 = vmatpush.msra.mxu2 %v137_v48  ;;  %370 = vmatpush.msrb.mxu1 %v367_v50 }
  0x49   :  { %306 = vmatpush.msrb.mxu0 %v289_v54  ;;  %v365_v54 = vld [vmem:[#allocation7 + $0x160] sm:$0xff] }
  0x4a   :  { %187 = vmatpush.msra.mxu2 %v134_v51  ;;  %371 = vmatpush.msrb.mxu1 %v366_v52  ;;  %v389_v51 = vperm.slane %v650_v36, 4 }
  0x4b   :  { %307 = vmatpush.msrb.mxu0 %v288_v57  ;;  %v125_v57 = vld [vmem:[#allocation8 + $0xe8] sm:$0xff] }
  0x4c   :  { %188 = vmatpush.msra.mxu2 %v131_v53  ;;  %372 = vmatpush.msrb.mxu1 %v365_v54 }
  0x4d   :  { %308 = vmatpush.msrb.mxu0 %v287_v62  ;;  %v361_v62 = vld [vmem:[#allocation7 + $0x140] sm:$0xff] }
  0x4e   :  { %373 = vmatpush.msrb.mxu1 %v364_v56 }
  0x4f   :  { %309 = vmatpush.msrb.mxu0 %v286_v2  ;;  %v113_v2 = vld [vmem:[#allocation8 + $0x88] sm:$0xff] }
  0x51   :  { %310 = vmatpush.msrb.mxu0 %v285_v7  ;;  %v358_v7 = vld [vmem:[#allocation7 + $0x128] sm:$0xff] }
  0x53   :  { %311 = vmatpush.msrb.mxu0 %v284_v11  ;;  %v357_v11 = vld [vmem:[#allocation7 + $0x120] sm:$0xff] }
  0x55   :  { %312 = vmatpush.msrb.mxu0 %v283_v16 }
  0x57   :  { %313 = vmatpush.msrb.mxu0 %v282_v20 }
  0xb5   :  { %v161_v55 = vpop.f32.mrf.mxu0 }
  0xba   :  { %v237_v58 = vpop.f32.mrf.mxu3 }
  0xbb   :  { %v639_v60 = vadd.f32 %v237_v58, %v161_v55  ;;  %v128_v55 = vld [vmem:[#allocation8 + $0x100] sm:$0xff]  ;;  %v363_v58 = vld [vmem:[#allocation7 + $0x150] sm:$0xff] }
  0xbc   :  { %189 = vmatpush.msra.mxu2 %v128_v55  ;;  %374 = vmatpush.msrb.mxu1 %v363_v58 }
  0xbd   :  { %v240_v63 = vrot.slane %v639_v60, 4  ;;  %v254_v0 = vmul.f32 %v639_v60, %v639_v60 }
  0xbe   :  { %190 = vmatpush.msra.mxu2 %v125_v57 }
  0xbf   :  { %v241_v4 = vadd.f32 %v240_v63, %v639_v60  ;;  %v255_v5 = vrot.slane %v254_v0, 4  ;;  %v116_v63 = vld [vmem:[#allocation8 + $0xa0] sm:$0xff] }
  0xc0   :  { %191 = vmatpush.msra.mxu2 %v122_v59 }
  0xc1   :  { %v242_v8 = vrot.slane %v241_v4, 2  ;;  %v256_v9 = vadd.f32 %v255_v5, %v254_v0  ;;  %v181_v0 = vpop.f32.mrf.mxu1 }
  0xc2   :  { %192 = vmatpush.msra.mxu2 %v119_v61 }
  0xc3   :  { %v243_v13 = vadd.f32 %v242_v8, %v241_v4  ;;  %v257_v14 = vrot.slane %v256_v9, 2  ;;  %v359_v4 = vld [vmem:[#allocation7 + $0x130] sm:$0xff] }
  0xc4   :  { %193 = vmatpush.msra.mxu2 %v116_v63 }
  0xc5   :  { %v244_v17 = vrot.slane %v243_v13, 1  ;;  %v258_v18 = vadd.f32 %v257_v14, %v256_v9  ;;  %v104_v14 = vld [vmem:[#allocation8 + $0x40] sm:$0xff] }
  0xc6   :  { %194 = vmatpush.msra.mxu2 %v113_v2 }
  0xc7   :  { %v259_v22 = vrot.slane %v258_v18, 1  ;;  %v245_v23 = vadd.f32 %v244_v17, %v243_v13 }
  0xc8   :  { %195 = vmatpush.msra.mxu2 %v110_v6 }
  0xc9   :  { %v260_v24 = vadd.f32 %v259_v22, %v258_v18  ;;  %v253_v25 = vmul.f32 %v645_v21, %v245_v23  ;;  %v101_v18 = vld [vmem:[#allocation8 + $0x28] sm:$0xff]  ;;  %v98_v23 = vld [vmem:[#allocation8 + $0x10] sm:$0xff] }
  0xca   :  { %196 = vmatpush.msra.mxu2 %v107_v10 }
  0xcb   :  { %v261_v26 = vmul.f32 %v260_v24, %v645_v21  ;;  %v262_v27 = vmul.f32 %v253_v25, %v253_v25  ;;  %v276_v40 = vsub.f32 %v639_v60, %v253_v25  ;;  %v362_v60 = vld [vmem:[#allocation7 + $0x148] sm:$0xff] }
  0xcc   :  { %375 = vmatpush.msrb.mxu1 %v362_v60  ;;  %197 = vmatpush.msra.mxu2 %v104_v14  ;;  %v354_v24 = vld [vmem:[#allocation7 + $0x108] sm:$0xff] }
  0xcd   :  { %v263_v28 = vsub.f32 %v261_v26, %v262_v27  ;;  %v353_v27 = vld [vmem:[#allocation7 + $0x100] sm:$0xff] }
  0xce   :  { %376 = vmatpush.msrb.mxu1 %v361_v62  ;;  %198 = vmatpush.msra.mxu2 %v101_v18 }
  0xcf   :  { %v264_v29 = vadd.f32 1e-05, %v263_v28 }
  0xd0   :  { %377 = vmatpush.msrb.mxu1 %v360_v1  ;;  %199 = vmatpush.msra.mxu2 %v98_v23 }
  0xd1   :  { %424 = vrsqrt.f32 %v264_v29  ;;  %vm271_vm2 = vweird.f32 %v264_v29  ;;  %200 = vmatmul.f32.vlgmr.msra.gmra.mxu2 %v636_v33 }
  0xd2   :  { %378 = vmatpush.msrb.mxu1 %v359_v4 }
  0xd4   :  { %379 = vmatpush.msrb.mxu1 %v358_v7 }
  0xd6   :  { %380 = vmatpush.msrb.mxu1 %v357_v11 }
  0xd7   :  { %v425_v30 = vpop.eup %424 }
  0xd8   :  { %v266_v31 = vmul.f32 %v425_v30, %v264_v29  ;;  %vm272_vm1 = vweird.f32 %v425_v30  ;;  %381 = vmatpush.msrb.mxu1 %v356_v15 }
  0xd9   :  { %vm273_vm3 = vmor %vm271_vm2, %vm272_vm1 }
  0xda   :  { %v267_v32 = vmul.f32 %v425_v30, %v266_v31  ;;  %382 = vmatpush.msrb.mxu1 %v355_v19 }
  0xdc   :  { %v268_v34 = vmul.f32 0.5, %v267_v32  ;;  %383 = vmatpush.msrb.mxu1 %v354_v24 }
  0xde   :  { %v269_v35 = vsub.f32 1.5, %v268_v34  ;;  %384 = vmatpush.msrb.mxu1 %v353_v27 }
  0xe0   :  { %v270_v37 = vmul.f32 %v425_v30, %v269_v35 }
  0xe2   :  { %v274_v38 = vsel %vm273_vm3, %v425_v30, %v270_v37 }
  0xe3   :  { %v275_v39 = vmul.f32 %v274_v38, %v650_v36 }
  0xe5   :  { %v277_v41 = vperm.slane %v275_v39, 0 }
  0xe7   :  { %v278_v43 = vmul.f32 %v277_v41, %v276_v40 }
  0xe9   :  { %v280_v44 = vadd.f32 %v279_v42, %v278_v43 }
  0xeb   :  { %v281_v45 = vmax.f32 %v280_v44, 0.0 }
  0xed   :  { %314 = vmatmul.f32.vlgmr.msrb.gmra.mxu0 %v281_v45 }
 0x154   :  { %v201_v50 = vpop.f32.mrf.mxu2 }
 0x16a   :  { %v315_v3 = vpop.f32.mrf.mxu0 }
 0x16b   :  { %v316_v5 = vadd.f32 %v315_v3, %v181_v0 }
 0x16d   :  { %v318_v8 = vrot.slane %v316_v5, 4  ;;  %v325_v9 = vmul.f32 %v316_v5, %v316_v5 }
 0x16f   :  { %v319_v12 = vadd.f32 %v318_v8, %v316_v5  ;;  %v326_v13 = vrot.slane %v325_v9, 4 }
 0x171   :  { %v320_v16 = vrot.slane %v319_v12, 2  ;;  %v327_v17 = vadd.f32 %v326_v13, %v325_v9 }
 0x173   :  { %v321_v20 = vadd.f32 %v320_v16, %v319_v12  ;;  %v328_v22 = vrot.slane %v327_v17, 2 }
 0x175   :  { %v322_v25 = vrot.slane %v321_v20, 1  ;;  %v329_v26 = vadd.f32 %v328_v22, %v327_v17 }
 0x177   :  { %v330_v28 = vrot.slane %v329_v26, 1  ;;  %v323_v29 = vadd.f32 %v322_v25, %v321_v20 }
 0x179   :  { %v331_v30 = vadd.f32 %v330_v28, %v329_v26  ;;  %v324_v31 = vmul.f32 %v323_v29, %v645_v21 }
 0x17b   :  { %v332_v32 = vmul.f32 %v331_v30, %v645_v21  ;;  %v333_v34 = vmul.f32 %v324_v31, %v324_v31  ;;  %v347_v45 = vsub.f32 %v316_v5, %v324_v31  ;;  %v350_v21 = vperm.slane %v650_v36, 3 }
 0x17d   :  { %v334_v35 = vsub.f32 %v332_v32, %v333_v34 }
 0x17f   :  { %v335_v37 = vadd.f32 1e-05, %v334_v35 }
 0x181   :  { %426 = vrsqrt.f32 %v335_v37  ;;  %vm342_vm5 = vweird.f32 %v335_v37 }
 0x187   :  { %v427_v38 = vpop.eup %426 }
 0x188   :  { %v337_v39 = vmul.f32 %v427_v38, %v335_v37  ;;  %vm343_vm4 = vweird.f32 %v427_v38 }
 0x189   :  { %vm344_vm6 = vmor %vm342_vm5, %vm343_vm4 }
 0x18a   :  { %v338_v40 = vmul.f32 %v427_v38, %v337_v39 }
 0x18c   :  { %v339_v41 = vmul.f32 0.5, %v338_v40 }
 0x18e   :  { %v340_v42 = vsub.f32 1.5, %v339_v41 }
 0x190   :  { %v341_v43 = vmul.f32 %v427_v38, %v340_v42 }
 0x192   :  { %v345_v33 = vsel %vm344_vm6, %v427_v38, %v341_v43 }
 0x193   :  { %v346_v44 = vmul.f32 %v345_v33, %v650_v36 }
 0x195   :  { %v348_v46 = vperm.slane %v346_v44, 2 }
 0x197   :  { %v349_v47 = vmul.f32 %v348_v46, %v347_v45 }
 0x199   :  { %v351_v48 = vadd.f32 %v350_v21, %v349_v47 }
 0x19b   :  { %v352_v49 = vmax.f32 %v351_v48, 0.0 }
 0x19d   :  { %385 = vmatmul.f32.vlgmr.msrb.gmra.mxu1 %v352_v49 }
 0x21a   :  { %v386_v52 = vpop.f32.mrf.mxu1 }
 0x21b   :  { %v387_v53 = vadd.f32 %v386_v52, %v201_v50 }
 0x21d   :  { %v390_v54 = vadd.f32 %v389_v51, %v387_v53 }
 0x21f   :  { %391 = vst [vmem:[#allocation11] sm:$0xff] %v390_v54 }
 0x220   :  { %402 = dma.vmem_to_hbm [thread:$0]  %s398_s4, 128, %s400_s21, [#allocation4]  }
 0x221   :  { %578 = dma.done.wait [#allocation4], 128  }
 0x222   :  { %579 = vsyncadd [#allocation4], 4294967168 }
 0x223   :  { %407 = vsyncpa [#allocation3], 1 }
 0x224   :  { %408 = vsyncpa [#allocation6], 1 }
 0x225   :  { %409 = vsyncpa [#allocation9], 1 }
 0x226   :  { %410 = vsyncpa [#allocation4], 1 }

</bundles_post_ra>
